<compile_context>
chip_gen: v6e
topology: v6e:2x2x1
jax: 0.10.0
libtpu: 0.0.40
codegen_flags: <defaults>
</compile_context>

<pallas_src>
import numpy as np

import jax
import jax.numpy as jnp
from jax import lax
from jax.experimental import pallas as pl
from jax.experimental.pallas import tpu as pltpu

# Shapes chosen so the conv output flattens to exactly 36 features, as
# required by dense_layer_1(in_features=36):  3 * 4 * 3 = 36.
C_IN, H, W = 1, 6, 5
KH = KW = 3
HO, WO = H - KH + 1, W - KW + 1          # 4, 3
P = HO * WO                              # 12 spatial positions
C_OUT = 3
FEAT = C_OUT * P                         # 36 == dense_layer_1 in_features
HID = 8
HW = H * W                               # 30 flattened input pixels

LANES = 128                              # lane-padded slab width
TB = 256                                 # batch tile (M dim of MXU pushes)

# Row offsets inside the packed weight slab (shape (ROWS, LANES) = (168, 128)).
R_WC = 0            # rows   0:30   conv-as-dense matrix (HW, LANES)
R_W1 = 32           # rows  32:160  W1 as a (LANES, LANES) block (K and N padded)
R_BC = 160          # row  160      conv bias expanded over the 36 feature lanes
R_B1 = 161          # row  161      b1 in lanes 0:HID
R_W2 = 162          # row  162      w2 row in lanes 0:HID
ROWS = 168          # padded to a sublane (8) multiple


def cnn_kernel(x_ref, w_ref, b2_ref, out_ref):
    # x_ref:  (tb, HW)      current batch tile (VMEM)
    # w_ref:  (ROWS, LANES) packed weight slab (VMEM, resident across steps)
    # b2_ref: (1, 1)        dense_layer_2 bias (SMEM scalar)
    xv = x_ref[...]                                    # (tb, 30)

    wc = w_ref[R_WC:R_WC + HW, :]                      # (30, 128) conv as dense
    w1 = w_ref[R_W1:R_W1 + LANES, :]                   # (128, 128) W1, zero-padded
    bc = w_ref[R_BC:R_BC + 1, :]                       # (1, 128)
    b1 = w_ref[R_B1:R_B1 + 1, :]                       # (1, 128)
    w2 = w_ref[R_W2:R_W2 + 1, :]                       # (1, 128)

    # conv (baked as a dense matmul) + bias, then square.  Features land in
    # (tb, 128) lane-dense layout; lanes 36: are exactly zero by construction.
    feat = jnp.dot(xv, wc, preferred_element_type=jnp.float32) + bc
    feat = feat * feat                                 # x = x * x

    # dense_layer_1 + square at full 128-lane width (padded lanes stay zero).
    h = jnp.dot(feat, w1, preferred_element_type=jnp.float32) + b1
    h = h * h                                          # x = x * x

    # dense_layer_2 on VPU (broadcast mul) + XLU (lane reduce); zero-padded
    # lanes of w2/h contribute nothing.  b2 comes from SMEM as a scalar.
    out_ref[...] = jnp.sum(h * w2, axis=-1, keepdims=True) + b2_ref[0, 0]


def prepare_kernel_params(params):
    """One-time (host-side) packing of PyTorch-layout params into the kernel
    weight slab + SMEM scalar.  Called once at init; NOT on the per-call path."""
    conv_w, conv_b, w1, b1, w2, b2 = (np.asarray(p, np.float32) for p in params)

    # Bake the stride-1 VALID conv into a dense (H*W, C_OUT*P) matrix whose
    # column order matches PyTorch's .view flatten order (c*P + i*WO + j).
    wc = np.zeros((HW, LANES), np.float32)
    for c in range(C_OUT):
        for i in range(HO):
            for j in range(WO):
                col = c * P + i * WO + j
                for dh in range(KH):
                    for dw in range(KW):
                        wc[(i + dh) * W + (j + dw), col] = conv_w[c, 0, dh, dw]

    slab = np.zeros((ROWS, LANES), np.float32)
    slab[R_WC:R_WC + HW, :] = wc                          # (30, 128)
    slab[R_W1:R_W1 + FEAT, 0:HID] = w1.T                  # (36, 8) inside (128,128)
    slab[R_BC, 0:FEAT] = np.repeat(conv_b, P)             # conv bias per feature
    slab[R_B1, 0:HID] = b1
    slab[R_W2, 0:HID] = w2[0]
    b2_arr = np.asarray(b2, np.float32).reshape(1, 1)
    return jnp.asarray(slab), jnp.asarray(b2_arr)


@jax.jit
def cnn_forward(x, w_slab, b2):
    # Per-call path: one (free) reshape + one pallas_call.
    B = x.shape[0]
    xf = x.reshape(B, HW)                                 # (B,1,H,W) -> (B,30)

    if B <= TB:
        tb, bp = B, B                                     # single grid step
    else:
        tb = TB
        bp = ((B + TB - 1) // TB) * TB
        if bp != B:
            xf = jnp.pad(xf, ((0, bp - B), (0, 0)))       # pad to tile multiple

    out = pl.pallas_call(
        cnn_kernel,
        out_shape=jax.ShapeDtypeStruct((bp, 1), jnp.float32),
        grid=(bp // tb,),
        in_specs=[
            # batch tile walks the grid
            pl.BlockSpec((tb, HW), lambda i: (i, 0)),
            # constant index_map: weight slab DMA'd once, VMEM-resident
            pl.BlockSpec((ROWS, LANES), lambda i: (0, 0)),
            # dense_layer_2 bias as an SMEM scalar
            pl.BlockSpec((1, 1), lambda i: (0, 0),
                         memory_space=pltpu.MemorySpace.SMEM),
        ],
        out_specs=pl.BlockSpec((tb, 1), lambda i: (i, 0)),
        compiler_params=pltpu.CompilerParams(
            dimension_semantics=("parallel",)),           # 2x on v7x (2 TCs)
    )(xf, w_slab, b2)

    return out if bp == B else out[:B]


def cnn_reference(x, params):
    # Pure-JAX reference mirroring the PyTorch forward exactly.
    conv_w, conv_b, w1, b1, w2, b2 = params
    y = lax.conv_general_dilated(x, conv_w, (1, 1), 'VALID',
                                 dimension_numbers=('NCHW', 'OIHW', 'NCHW'))
    y = y + conv_b.reshape(1, C_OUT, 1, 1)
    y = y * y
    y = y.reshape(x.shape[0], -1)
    y = y @ w1.T + b1
    y = y * y
    y = y @ w2.T + b2
    return y


def init_params(key):
    # Deterministic init, PyTorch-style uniform(-1/sqrt(fan_in), 1/sqrt(fan_in)).
    ks = jax.random.split(key, 6)
    b_conv = 1.0 / (C_IN * KH * KW) ** 0.5
    b_l1 = 1.0 / FEAT ** 0.5
    b_l2 = 1.0 / HID ** 0.5
    conv_w = jax.random.uniform(ks[0], (C_OUT, C_IN, KH, KW), jnp.float32,
                                -b_conv, b_conv)
    conv_b = jax.random.uniform(ks[1], (C_OUT,), jnp.float32, -b_conv, b_conv)
    w1 = jax.random.uniform(ks[2], (HID, FEAT), jnp.float32, -b_l1, b_l1)
    b1 = jax.random.uniform(ks[3], (HID,), jnp.float32, -b_l1, b_l1)
    w2 = jax.random.uniform(ks[4], (1, HID), jnp.float32, -b_l2, b_l2)
    b2 = jax.random.uniform(ks[5], (1,), jnp.float32, -b_l2, b_l2)
    return conv_w, conv_b, w1, b1, w2, b2


if __name__ == "__main__":
    key = jax.random.PRNGKey(0)
    k_x, k_p = jax.random.split(key)
    params = init_params(k_p)

    # One-time static weight prep (hoisted out of the per-call path).
    w_slab, b2 = prepare_kernel_params(params)

    # Batched path: 512 samples -> grid=(2,), TB=256 per step (parallel axis).
    B_big = 512
    x_big = jax.random.normal(k_x, (B_big, C_IN, H, W), jnp.float32)
    out_big = jax.block_until_ready(cnn_forward(x_big, w_slab, b2))
    ref_big = cnn_reference(x_big, params)
    assert out_big.shape == (B_big, 1)
    assert jnp.allclose(out_big, ref_big, atol=1e-5, rtol=1e-5)

    # Original tiny-batch case (batch=2), same kernel, single grid step.
    x_small = x_big[:2]
    out_small = jax.block_until_ready(cnn_forward(x_small, w_slab, b2))
    assert out_small.shape == (2, 1)
    assert jnp.allclose(out_small, ref_big[:2], atol=1e-5, rtol=1e-5)

    print("KERNEL_OK")
</pallas_src>

<mosaic_0001>
module attributes {stable_mosaic.version = 11 : i64} {
  func.func @cnn_kernel(%arg0: i32, %arg1: memref<256x30xf32, #tpu.memory_space<vmem>>, %arg2: memref<168x128xf32, #tpu.memory_space<vmem>>, %arg3: memref<1x1xf32, #tpu.memory_space<smem>>, %arg4: memref<256x1xf32, #tpu.memory_space<vmem>>) attributes {dimension_semantics = [#tpu.dimension_semantics<parallel>], iteration_bounds = array<i64: 2>, scalar_prefetch = 0 : i64, scratch_operands = 0 : i64, tpu.core_type = #tpu.core_type<tc>, window_params = [{transform_indices = @transform_0, window_bounds = array<i64: 256, 30>}, {pipeline_mode = #tpu.pipeline_mode<synchronous>, transform_indices = @transform_1, window_bounds = array<i64: 168, 128>}, {transform_indices = @transform_2, window_bounds = array<i64: 1, 1>}, {transform_indices = @transform_3, window_bounds = array<i64: 256, 1>}]} {
    %c0 = arith.constant 0 : index
    %c0_0 = arith.constant 0 : index
    %0 = vector.load %arg1[%c0, %c0_0] : memref<256x30xf32, #tpu.memory_space<vmem>>, vector<256x30xf32>
    %c0_1 = arith.constant 0 : index
    %c0_2 = arith.constant 0 : index
    %1 = vector.load %arg2[%c0_1, %c0_2] : memref<168x128xf32, #tpu.memory_space<vmem>>, vector<30x128xf32>
    %c32 = arith.constant 32 : index
    %c0_3 = arith.constant 0 : index
    %2 = vector.load %arg2[%c32, %c0_3] : memref<168x128xf32, #tpu.memory_space<vmem>>, vector<128x128xf32>
    %c160 = arith.constant 160 : index
    %c0_4 = arith.constant 0 : index
    %3 = vector.load %arg2[%c160, %c0_4] : memref<168x128xf32, #tpu.memory_space<vmem>>, vector<1x128xf32>
    %c161 = arith.constant 161 : index
    %c0_5 = arith.constant 0 : index
    %4 = vector.load %arg2[%c161, %c0_5] : memref<168x128xf32, #tpu.memory_space<vmem>>, vector<1x128xf32>
    %c162 = arith.constant 162 : index
    %c0_6 = arith.constant 0 : index
    %5 = vector.load %arg2[%c162, %c0_6] : memref<168x128xf32, #tpu.memory_space<vmem>>, vector<1x128xf32>
    %cst = arith.constant dense<0.000000e+00> : vector<256x128xf32>
    %6 = tpu.matmul %0, %1, %cst {dimension_numbers = #tpu.dot_dimension_numbers<[1], [0], [0], [1], [0, 0, 1, 1], [], []>} : vector<256x30xf32>, vector<30x128xf32>, vector<256x128xf32> -> vector<256x128xf32>
    %7 = vector.broadcast %3 : vector<1x128xf32> to vector<256x128xf32>
    %8 = arith.addf %6, %7 : vector<256x128xf32>
    %9 = arith.mulf %8, %8 : vector<256x128xf32>
    %cst_7 = arith.constant dense<0.000000e+00> : vector<256x128xf32>
    %10 = tpu.matmul %9, %2, %cst_7 {dimension_numbers = #tpu.dot_dimension_numbers<[1], [0], [0], [1], [0, 0, 1, 1], [], []>} : vector<256x128xf32>, vector<128x128xf32>, vector<256x128xf32> -> vector<256x128xf32>
    %11 = vector.broadcast %4 : vector<1x128xf32> to vector<256x128xf32>
    %12 = arith.addf %10, %11 : vector<256x128xf32>
    %13 = arith.mulf %12, %12 : vector<256x128xf32>
    %14 = vector.broadcast %5 : vector<1x128xf32> to vector<256x128xf32>
    %15 = arith.mulf %13, %14 : vector<256x128xf32>
    %cst_8 = arith.constant dense<0.000000e+00> : vector<256xf32>
    %16 = vector.multi_reduction <add>, %15, %cst_8 [1] : vector<256x128xf32> to vector<256xf32>
    %17 = vector.shape_cast %16 : vector<256xf32> to vector<256x1xf32>
    %c0_9 = arith.constant 0 : index
    %c0_10 = arith.constant 0 : index
    %18 = memref.load %arg3[%c0_9, %c0_10] : memref<1x1xf32, #tpu.memory_space<smem>>
    %19 = vector.broadcast %18 : f32 to vector<256x1xf32>
    %20 = arith.addf %17, %19 : vector<256x1xf32>
    %c0_11 = arith.constant 0 : index
    %c0_12 = arith.constant 0 : index
    %21 = vector.load %arg4[%c0_11, %c0_12] : memref<256x1xf32, #tpu.memory_space<vmem>>, vector<256x1xf32>
    tpu.vector_store %arg4[%c0_11, %c0_12], %20 {strides = array<i32>} : memref<256x1xf32, #tpu.memory_space<vmem>>, vector<256x1xf32>,
    return
  }
  func.func @transform_0(%arg0: i32) -> (i32, i32) {
    %c0_i32 = arith.constant 0 : i32
    %c0_i32_0 = arith.constant 0 : i32
    return %arg0, %c0_i32 : i32, i32
  }
  func.func @transform_1(%arg0: i32) -> (i32, i32) {
    %c0_i32 = arith.constant 0 : i32
    %c0_i32_0 = arith.constant 0 : i32
    %c0_i32_1 = arith.constant 0 : i32
    return %c0_i32, %c0_i32_0 : i32, i32
  }
  func.func @transform_2(%arg0: i32) -> (i32, i32) {
    %c0_i32 = arith.constant 0 : i32
    %c0_i32_0 = arith.constant 0 : i32
    %c0_i32_1 = arith.constant 0 : i32
    return %c0_i32, %c0_i32_0 : i32, i32
  }
  func.func @transform_3(%arg0: i32) -> (i32, i32) {
    %c0_i32 = arith.constant 0 : i32
    %c0_i32_0 = arith.constant 0 : i32
    return %arg0, %c0_i32 : i32, i32
  }
}

</mosaic_0001>

<bundles_post_ra>
// kernel: cnn_forward.1
= control target key start
LH: loop header
LB: loop body
LE: loop exit
PB: predicated region body
PF: predicated region fallthrough
CT: control target
= control target key end

     0   :  { %s1414_s14 = smov 0   ;;  %s1775_s0 = inlined_call_operand.vmem [shape: f32[512,30], index: 0, kind: input, shape index: {}]   ;;  %s1776_s1 = inlined_call_operand.vmem [shape: f32[168,128], index: 1, kind: input, shape index: {}]   ;;  %s1777_s2 = inlined_call_operand.<no memory space> [shape: f32[1,1], index: 2, kind: input, shape index: {}]   ;;  %s1778_s3 = inlined_call_operand.vmem [shape: f32[512,1], index: 3, kind: output, shape index: {}]  }
   0x1   :  { %8 = sst [smem:[#allocation2]] %s1777_s2 }
   0x2 LB: > { %s1076_s15 = sadd.s32 4294967295, %s1389_s14   ;;  %p1080_p0 = scmp.ge.s32.totalorder %s1389_s14, 1  ;;  %s1389_s14 = sphi %s1414_s14, %s14_s14  }
   0x3   : > { %p139_p1 = scmp.lt.s32.totalorder %s1389_s14, 3 }
   0x5   : > { %p140_p2 = pnand %p1080_p0, %p139_p1 }
   0x6   : > { %s1081_s19 = sshll.u32 (!%p140_p2), %s1076_s15, 5  ;;  %s953_s15 = sld [smem:[#allocation2]] (!%p140_p2) }
   0x7   : > { %143 = sbr.rel (%p140_p2) target bundleno = 625 (0x271), region = 32  ;;  %p164_p3 = scmp.lt.s32.totalorder (!%p140_p2), %s1081_s19, 63 }
   0xc   : > { %v210_v0 = vld [vmem:[%s1776_s1 + $0x18] sm:$0x3f]  ;;  %vm331_vm0 = vcmask 1045504   ;;  %v209_v1 = vld [vmem:[%s1776_s1 + $0x10] sm:$0xff]  ;;  %v208_v3 = vld [vmem:[%s1776_s1 + $0x8] sm:$0xff]  ;;  %s1780_s19 = smov (!%p164_p3, %s1081_s19), 63 }
   0xd   : > { %1207 = vmatprep.subr.msk.mxu0 %vm331_vm0, %v210_v0  ;;  %v226_v2 = vld [vmem:[%s1776_s1 + $0x98] sm:$0xff]  ;;  %v225_v4 = vld [vmem:[%s1776_s1 + $0x90] sm:$0xff]  ;;  %v207_v5 = vld [vmem:[%s1776_s1] sm:$0xff]  ;;  %s1082_s28 = sshll.u32 %s1780_s19, 3  ;;  %vm234_vm1 = vcmask 244736   ;;  %vm987_vm2 = vcmask 7168  }
   0xe   : > { %1208 = vmatpush3.msk.msra.mxu0 %vm331_vm0, %v210_v0  ;;  %1343 = vmatprep.subr.mxu1 %v226_v2  ;;  %v224_v6 = vld [vmem:[%s1776_s1 + $0x88] sm:$0xff]  ;;  %s1451_s6 = scalar_lea.vmem %s1775_s0, %s1082_s28  ;;  %v223_v11 = vld [vmem:[%s1776_s1 + $0x80] sm:$0xff]  ;;  %v222_v14 = vld [vmem:[%s1776_s1 + $0x78] sm:$0xff]  ;;  %s1674_s2 = scalar_lea.vmem %s1778_s3, %s1082_s28 }
   0xf   : > { %1209 = vmatprep.subr.mxu0 %v209_v1  ;;  %1359 = vmatpush3.msra.mxu1 %v226_v2  ;;  %v175_v7 = vld [vmem:[%s1451_s6] sm:$0xff]  ;;  %v176_v8 = vld [vmem:[%s1451_s6 + $0x8] sm:$0xff]  ;;  %v177_v9 = vld [vmem:[%s1451_s6 + $0x10] sm:$0xff] }
  0x10   : > { %1210 = vmatpush3.msra.mxu0 %v209_v1  ;;  %1344 = vmatprep.subr.mxu1 %v225_v4  ;;  %v178_v10 = vld [vmem:[%s1451_s6 + $0x18] sm:$0xff]  ;;  %v179_v12 = vld [vmem:[%s1451_s6 + $0x20] sm:$0xff]  ;;  %v180_v13 = vld [vmem:[%s1451_s6 + $0x28] sm:$0xff] }
  0x11   : > { %1211 = vmatprep.subr.mxu0 %v208_v3  ;;  %1360 = vmatpush3.msra.mxu1 %v225_v4  ;;  %v181_v15 = vld [vmem:[%s1451_s6 + $0x30] sm:$0xff]  ;;  %v182_v17 = vld [vmem:[%s1451_s6 + $0x38] sm:$0xff]  ;;  %v220_v18 = vld [vmem:[%s1776_s1 + $0x68] sm:$0xff] }
  0x12   : > { %1212 = vmatpush3.msra.mxu0 %v208_v3  ;;  %1345 = vmatprep.subr.mxu1 %v224_v6  ;;  %v221_v16 = vld [vmem:[%s1776_s1 + $0x70] sm:$0xff]  ;;  %v183_v19 = vld [vmem:[%s1451_s6 + $0x40] sm:$0xff]  ;;  %v184_v21 = vld [vmem:[%s1451_s6 + $0x48] sm:$0xff] }
  0x13   : > { %1213 = vmatprep.subr.mxu0 %v207_v5  ;;  %1361 = vmatpush3.msra.mxu1 %v224_v6  ;;  %v219_v20 = vld [vmem:[%s1776_s1 + $0x60] sm:$0xff]  ;;  %v218_v22 = vld [vmem:[%s1776_s1 + $0x58] sm:$0xff]  ;;  %v185_v23 = vld [vmem:[%s1451_s6 + $0x50] sm:$0xff] }
  0x14   : > { %1214 = vmatpush3.msra.mxu0 %v207_v5  ;;  %1215 = vmatprep.mubr.msk.f32.mxu0 %vm234_vm1, %v175_v7  ;;  %v217_v24 = vld [vmem:[%s1776_s1 + $0x50] sm:$0xff]  ;;  %v186_v25 = vld [vmem:[%s1451_s6 + $0x58] sm:$0xff]  ;;  %v216_v26 = vld [vmem:[%s1776_s1 + $0x48] sm:$0xff] }
  0x15   : > { %1216 = vmatmul.mubr.msk.f32.vlgmr.msra.gmra.mxu0 %vm234_vm1, %v176_v8  ;;  %1263 = vmatprep.subr.mxu0 %v226_v2  ;;  %v187_v27 = vld [vmem:[%s1451_s6 + $0x60] sm:$0xff]  ;;  %v188_v29 = vld [vmem:[%s1451_s6 + $0x68] sm:$0xff]  ;;  %v214_v30 = vld [vmem:[%s1776_s1 + $0x38] sm:$0xff] }
  0x16   : > { %1218 = vmatprep.mubr.msk.f32.mxu0 %vm234_vm1, %v177_v9  ;;  %1264 = vmatpush3.msra.mxu0 %v226_v2  ;;  %v215_v28 = vld [vmem:[%s1776_s1 + $0x40] sm:$0xff]  ;;  %v189_v31 = vld [vmem:[%s1451_s6 + $0x70] sm:$0xff]  ;;  %v190_v33 = vld [vmem:[%s1451_s6 + $0x78] sm:$0xff] }
  0x17   : > { %1265 = vmatprep.subr.mxu0 %v225_v4  ;;  %1346 = vmatprep.subr.mxu1 %v223_v11  ;;  %v213_v32 = vld [vmem:[%s1776_s1 + $0x30] sm:$0xff]  ;;  %v212_v34 = vld [vmem:[%s1776_s1 + $0x28] sm:$0xff]  ;;  %v191_v35 = vld [vmem:[%s1451_s6 + $0x80] sm:$0xff] }
  0x18   : > { %1266 = vmatpush3.msra.mxu0 %v225_v4  ;;  %1362 = vmatpush3.msra.mxu1 %v223_v11  ;;  %v192_v36 = vld [vmem:[%s1451_s6 + $0x88] sm:$0xff]  ;;  %v193_v37 = vld [vmem:[%s1451_s6 + $0x90] sm:$0xff]  ;;  %v194_v38 = vld [vmem:[%s1451_s6 + $0x98] sm:$0xff] }
  0x19   : > { %1219 = vmatmul.mubr.msk.f32.gmra.mxu0 %vm234_vm1, %v178_v10  ;;  %1267 = vmatprep.subr.mxu0 %v224_v6  ;;  %v195_v39 = vld [vmem:[%s1451_s6 + $0xa0] sm:$0xff]  ;;  %v196_v40 = vld [vmem:[%s1451_s6 + $0xa8] sm:$0xff]  ;;  %v197_v41 = vld [vmem:[%s1451_s6 + $0xb0] sm:$0xff] }
  0x1a   : > { %1221 = vmatprep.mubr.msk.f32.mxu0 %vm234_vm1, %v179_v12  ;;  %1268 = vmatpush3.msra.mxu0 %v224_v6  ;;  %v198_v42 = vld [vmem:[%s1451_s6 + $0xb8] sm:$0xff]  ;;  %v199_v43 = vld [vmem:[%s1451_s6 + $0xc0] sm:$0xff]  ;;  %v200_v44 = vld [vmem:[%s1451_s6 + $0xc8] sm:$0xff] }
  0x1b   : > { %1269 = vmatprep.subr.mxu0 %v223_v11  ;;  %1347 = vmatprep.subr.mxu1 %v222_v14  ;;  %v201_v45 = vld [vmem:[%s1451_s6 + $0xd0] sm:$0xff]  ;;  %v202_v46 = vld [vmem:[%s1451_s6 + $0xd8] sm:$0xff]  ;;  %v203_v47 = vld [vmem:[%s1451_s6 + $0xe0] sm:$0xff] }
  0x1c   : > { %1270 = vmatpush3.msra.mxu0 %v223_v11  ;;  %1363 = vmatpush3.msra.mxu1 %v222_v14  ;;  %v204_v48 = vld [vmem:[%s1451_s6 + $0xe8] sm:$0xff]  ;;  %v205_v49 = vld [vmem:[%s1451_s6 + $0xf0] sm:$0xff]  ;;  %v206_v50 = vld [vmem:[%s1451_s6 + $0xf8] sm:$0xff] }
  0x1d   : > { %1222 = vmatmul.mubr.msk.f32.gmra.mxu0 %vm234_vm1, %v180_v13  ;;  %1271 = vmatprep.subr.mxu0 %v222_v14  ;;  %v211_v51 = vld [vmem:[%s1776_s1 + $0x20] sm:$0xff] }
  0x1e   : > { %1224 = vmatprep.mubr.msk.f32.mxu0 %vm234_vm1, %v181_v15  ;;  %1272 = vmatpush3.msra.mxu0 %v222_v14  ;;  %v1559_v52 = vld [vmem:[%s1776_s1 + $0xa0] ss:$0 sm:$0xff] }
  0x1f   : > { %1273 = vmatprep.subr.mxu0 %v221_v16  ;;  %1348 = vmatprep.subr.mxu1 %v221_v16 }
  0x20   : > { %1274 = vmatpush3.msra.mxu0 %v221_v16  ;;  %1364 = vmatpush3.msra.mxu1 %v221_v16 }
  0x21   : > { %1225 = vmatmul.mubr.msk.f32.gmra.mxu0 %vm234_vm1, %v182_v17  ;;  %1275 = vmatprep.subr.mxu0 %v220_v18 }
  0x22   : > { %1227 = vmatprep.mubr.msk.f32.mxu0 %vm234_vm1, %v183_v19  ;;  %1276 = vmatpush3.msra.mxu0 %v220_v18 }
  0x23   : > { %1277 = vmatprep.subr.mxu0 %v219_v20  ;;  %1349 = vmatprep.subr.mxu1 %v220_v18 }
  0x24   : > { %1278 = vmatpush3.msra.mxu0 %v219_v20  ;;  %1365 = vmatpush3.msra.mxu1 %v220_v18 }
  0x25   : > { %1228 = vmatmul.mubr.msk.f32.gmra.mxu0 %vm234_vm1, %v184_v21  ;;  %1279 = vmatprep.subr.mxu0 %v218_v22 }
  0x26   : > { %1230 = vmatprep.mubr.msk.f32.mxu0 %vm234_vm1, %v185_v23  ;;  %1280 = vmatpush3.msra.mxu0 %v218_v22 }
  0x27   : > { %1281 = vmatprep.subr.mxu0 %v217_v24  ;;  %1350 = vmatprep.subr.mxu1 %v219_v20 }
  0x28   : > { %1282 = vmatpush3.msra.mxu0 %v217_v24  ;;  %1366 = vmatpush3.msra.mxu1 %v219_v20 }
  0x29   : > { %1231 = vmatmul.mubr.msk.f32.gmra.mxu0 %vm234_vm1, %v186_v25  ;;  %1283 = vmatprep.subr.mxu0 %v216_v26 }
  0x2a   : > { %1233 = vmatprep.mubr.msk.f32.mxu0 %vm234_vm1, %v187_v27  ;;  %1284 = vmatpush3.msra.mxu0 %v216_v26 }
  0x2b   : > { %1285 = vmatprep.subr.mxu0 %v215_v28  ;;  %1351 = vmatprep.subr.mxu1 %v218_v22 }
  0x2c   : > { %1286 = vmatpush3.msra.mxu0 %v215_v28  ;;  %1367 = vmatpush3.msra.mxu1 %v218_v22 }
  0x2d   : > { %1234 = vmatmul.mubr.msk.f32.gmra.mxu0 %vm234_vm1, %v188_v29  ;;  %1287 = vmatprep.subr.mxu0 %v214_v30 }
  0x2e   : > { %1236 = vmatprep.mubr.msk.f32.mxu0 %vm234_vm1, %v189_v31  ;;  %1288 = vmatpush3.msra.mxu0 %v214_v30 }
  0x2f   : > { %1289 = vmatprep.subr.mxu0 %v213_v32  ;;  %1352 = vmatprep.subr.mxu1 %v217_v24 }
  0x30   : > { %1290 = vmatpush3.msra.mxu0 %v213_v32  ;;  %1368 = vmatpush3.msra.mxu1 %v217_v24 }
  0x31   : > { %1237 = vmatmul.mubr.msk.f32.gmra.mxu0 %vm234_vm1, %v190_v33  ;;  %1291 = vmatprep.subr.mxu0 %v212_v34 }
  0x32   : > { %1239 = vmatprep.mubr.msk.f32.mxu0 %vm234_vm1, %v191_v35  ;;  %1292 = vmatpush3.msra.mxu0 %v212_v34 }
  0x33   : > { %1353 = vmatprep.subr.mxu1 %v216_v26  ;;  %1293 = vmatprep.subr.mxu0 %v211_v51 }
  0x34   : > { %1369 = vmatpush3.msra.mxu1 %v216_v26  ;;  %1294 = vmatpush3.msra.mxu0 %v211_v51 }
  0x35   : > { %1240 = vmatmul.mubr.msk.f32.gmra.mxu0 %vm234_vm1, %v192_v36  ;;  %1354 = vmatprep.subr.mxu1 %v215_v28 }
  0x36   : > { %1242 = vmatprep.mubr.msk.f32.mxu0 %vm234_vm1, %v193_v37  ;;  %1370 = vmatpush3.msra.mxu1 %v215_v28 }
  0x37   : > { %1355 = vmatprep.subr.mxu1 %v214_v30 }
  0x38   : > { %1371 = vmatpush3.msra.mxu1 %v214_v30 }
  0x39   : > { %1243 = vmatmul.mubr.msk.f32.gmra.mxu0 %vm234_vm1, %v194_v38  ;;  %1356 = vmatprep.subr.mxu1 %v213_v32 }
  0x3a   : > { %1245 = vmatprep.mubr.msk.f32.mxu0 %vm234_vm1, %v195_v39  ;;  %1372 = vmatpush3.msra.mxu1 %v213_v32 }
  0x3b   : > { %1357 = vmatprep.subr.mxu1 %v212_v34 }
  0x3c   : > { %1373 = vmatpush3.msra.mxu1 %v212_v34 }
  0x3d   : > { %1246 = vmatmul.mubr.msk.f32.gmra.mxu0 %vm234_vm1, %v196_v40  ;;  %1358 = vmatprep.subr.mxu1 %v211_v51 }
  0x3e   : > { %1248 = vmatprep.mubr.msk.f32.mxu0 %vm234_vm1, %v197_v41  ;;  %1374 = vmatpush3.msra.mxu1 %v211_v51 }
  0x41   : > { %1249 = vmatmul.mubr.msk.f32.gmra.mxu0 %vm234_vm1, %v198_v42 }
  0x42   : > { %1251 = vmatprep.mubr.msk.f32.mxu0 %vm234_vm1, %v199_v43 }
  0x45   : > { %1252 = vmatmul.mubr.msk.f32.gmra.mxu0 %vm234_vm1, %v200_v44 }
  0x46   : > { %1254 = vmatprep.mubr.msk.f32.mxu0 %vm234_vm1, %v201_v45 }
  0x49   : > { %1255 = vmatmul.mubr.msk.f32.gmra.mxu0 %vm234_vm1, %v202_v46 }
  0x4a   : > { %1257 = vmatprep.mubr.msk.f32.mxu0 %vm234_vm1, %v203_v47 }
  0x4d   : > { %1258 = vmatmul.mubr.msk.f32.gmra.mxu0 %vm234_vm1, %v204_v48 }
  0x4e   : > { %1260 = vmatprep.mubr.msk.f32.mxu0 %vm234_vm1, %v205_v49 }
  0x51   : > { %1261 = vmatmul.mubr.msk.f32.gmra.mxu0 %vm234_vm1, %v206_v50 }
  0xd5   : > { %v1217_v53 = vpop.f32.mrf.mxu0 }
  0xd6   : > { %v407_v54 = vadd.f32 %v1217_v53, %v1559_v52 }
  0xd7   : > { %v401_v55 = vpop.f32.mrf.mxu0 }
  0xd8   : > { %v402_v56 = vadd.f32 %v1559_v52, %v401_v55  ;;  %v561_v59 = vmul.f32 %v407_v54, %v407_v54 }
  0xd9   : > { %v1220_v57 = vpop.f32.mrf.mxu0 }
  0xda   : > { %v560_v58 = vmul.f32 %v402_v56, %v402_v56  ;;  %v417_v60 = vadd.f32 %v1220_v57, %v1559_v52 }
  0xdb   : > { %v411_v61 = vpop.f32.mrf.mxu0 }
  0xdc   : > { %v412_v62 = vadd.f32 %v1559_v52, %v411_v61  ;;  %1295 = vmatprep.mubr.f32.mxu0 %v560_v58  ;;  %v563_v2 = vmul.f32 %v417_v60, %v417_v60 }
  0xdd   : > { %v1223_v63 = vpop.f32.mrf.mxu0  ;;  %1296 = vmatmul.mubr.f32.vlgmr.msra.gmra.mxu0 %v561_v59 }
  0xde   : > { %v562_v0 = vmul.f32 %v412_v62, %v412_v62  ;;  %v427_v1 = vadd.f32 %v1223_v63, %v1559_v52 }
  0xdf   : > { %v421_v3 = vpop.f32.mrf.mxu0 }
  0xe0   : > { %v422_v4 = vadd.f32 %v1559_v52, %v421_v3  ;;  %1298 = vmatprep.mubr.f32.mxu0 %v562_v0  ;;  %v565_v5 = vmul.f32 %v427_v1, %v427_v1 }
  0xe1   : > { %v1226_v6 = vpop.f32.mrf.mxu0  ;;  %1299 = vmatmul.mubr.f32.gmra.mxu0 %v563_v2 }
  0xe2   : > { %v564_v7 = vmul.f32 %v422_v4, %v422_v4  ;;  %v437_v8 = vadd.f32 %v1226_v6, %v1559_v52 }
  0xe3   : > { %v431_v9 = vpop.f32.mrf.mxu0 }
  0xe4   : > { %1301 = vmatprep.mubr.f32.mxu0 %v564_v7  ;;  %v432_v10 = vadd.f32 %v1559_v52, %v431_v9  ;;  %v567_v11 = vmul.f32 %v437_v8, %v437_v8 }
  0xe5   : > { %v1229_v12 = vpop.f32.mrf.mxu0  ;;  %1302 = vmatmul.mubr.f32.gmra.mxu0 %v565_v5 }
  0xe6   : > { %v447_v13 = vadd.f32 %v1229_v12, %v1559_v52  ;;  %v566_v14 = vmul.f32 %v432_v10, %v432_v10 }
  0xe7   : > { %v441_v15 = vpop.f32.mrf.mxu0 }
  0xe8   : > { %v442_v16 = vadd.f32 %v1559_v52, %v441_v15  ;;  %1304 = vmatprep.mubr.f32.mxu1 %v566_v14  ;;  %v569_v17 = vmul.f32 %v447_v13, %v447_v13 }
  0xe9   : > { %v1232_v18 = vpop.f32.mrf.mxu0  ;;  %1305 = vmatmul.mubr.f32.vlgmr.msra.gmra.mxu1 %v567_v11 }
  0xea   : > { %v568_v19 = vmul.f32 %v442_v16, %v442_v16  ;;  %v457_v20 = vadd.f32 %v1232_v18, %v1559_v52 }
  0xeb   : > { %v451_v21 = vpop.f32.mrf.mxu0 }
  0xec   : > { %v452_v22 = vadd.f32 %v1559_v52, %v451_v21  ;;  %1307 = vmatprep.mubr.f32.mxu1 %v568_v19  ;;  %v571_v23 = vmul.f32 %v457_v20, %v457_v20 }
  0xed   : > { %v1235_v24 = vpop.f32.mrf.mxu0  ;;  %1308 = vmatmul.mubr.f32.gmra.mxu1 %v569_v17 }
  0xee   : > { %v570_v25 = vmul.f32 %v452_v22, %v452_v22  ;;  %v467_v26 = vadd.f32 %v1235_v24, %v1559_v52  ;;  %v1596_v22 = vld [vmem:[%s1776_s1 + $0xa1] ss:$0 sm:$0xff] }
  0xef   : > { %v461_v27 = vpop.f32.mrf.mxu0 }
  0xf0   : > { %v462_v28 = vadd.f32 %v1559_v52, %v461_v27  ;;  %1310 = vmatprep.mubr.f32.mxu1 %v570_v25  ;;  %v573_v29 = vmul.f32 %v467_v26, %v467_v26  ;;  %v1602_v26 = vld [vmem:[%s1776_s1 + $0xa2] ss:$0 sm:$0xff] }
  0xf1   : > { %v1238_v30 = vpop.f32.mrf.mxu0  ;;  %1311 = vmatmul.mubr.f32.gmra.mxu1 %v571_v23 }
  0xf2   : > { %v572_v31 = vmul.f32 %v462_v28, %v462_v28  ;;  %v477_v32 = vadd.f32 %v1238_v30, %v1559_v52 }
  0xf3   : > { %v471_v33 = vpop.f32.mrf.mxu0 }
  0xf4   : > { %v472_v34 = vadd.f32 %v1559_v52, %v471_v33  ;;  %1313 = vmatprep.mubr.f32.mxu1 %v572_v31  ;;  %v575_v35 = vmul.f32 %v477_v32, %v477_v32 }
  0xf5   : > { %v1241_v36 = vpop.f32.mrf.mxu0  ;;  %1314 = vmatmul.mubr.f32.gmra.mxu1 %v573_v29 }
  0xf6   : > { %v574_v37 = vmul.f32 %v472_v34, %v472_v34  ;;  %v487_v38 = vadd.f32 %v1241_v36, %v1559_v52 }
  0xf7   : > { %v481_v39 = vpop.f32.mrf.mxu0 }
  0xf8   : > { %v482_v40 = vadd.f32 %v1559_v52, %v481_v39  ;;  %1316 = vmatprep.mubr.f32.mxu1 %v574_v37  ;;  %v577_v41 = vmul.f32 %v487_v38, %v487_v38 }
  0xf9   : > { %v1244_v42 = vpop.f32.mrf.mxu0  ;;  %1317 = vmatmul.mubr.f32.gmra.mxu1 %v575_v35 }
  0xfa   : > { %v576_v43 = vmul.f32 %v482_v40, %v482_v40  ;;  %v497_v44 = vadd.f32 %v1244_v42, %v1559_v52 }
  0xfb   : > { %v491_v45 = vpop.f32.mrf.mxu0 }
  0xfc   : > { %v492_v46 = vadd.f32 %v1559_v52, %v491_v45  ;;  %1319 = vmatprep.mubr.f32.mxu1 %v576_v43  ;;  %v579_v47 = vmul.f32 %v497_v44, %v497_v44 }
  0xfd   : > { %v1247_v48 = vpop.f32.mrf.mxu0  ;;  %1320 = vmatmul.mubr.f32.gmra.mxu1 %v577_v41 }
  0xfe   : > { %v578_v49 = vmul.f32 %v492_v46, %v492_v46  ;;  %v507_v50 = vadd.f32 %v1247_v48, %v1559_v52 }
  0xff   : > { %v501_v51 = vpop.f32.mrf.mxu0 }
 0x100   : > { %v502_v53 = vadd.f32 %v1559_v52, %v501_v51  ;;  %1322 = vmatprep.mubr.f32.mxu1 %v578_v49  ;;  %v581_v54 = vmul.f32 %v507_v50, %v507_v50 }
 0x101   : > { %v1250_v55 = vpop.f32.mrf.mxu0  ;;  %1323 = vmatmul.mubr.f32.gmra.mxu1 %v579_v47 }
 0x102   : > { %v580_v56 = vmul.f32 %v502_v53, %v502_v53  ;;  %v517_v57 = vadd.f32 %v1250_v55, %v1559_v52 }
 0x103   : > { %v511_v58 = vpop.f32.mrf.mxu0 }
 0x104   : > { %v512_v59 = vadd.f32 %v1559_v52, %v511_v58  ;;  %1325 = vmatprep.mubr.f32.mxu1 %v580_v56  ;;  %v583_v60 = vmul.f32 %v517_v57, %v517_v57 }
 0x105   : > { %v1253_v61 = vpop.f32.mrf.mxu0  ;;  %1326 = vmatmul.mubr.f32.gmra.mxu1 %v581_v54 }
 0x106   : > { %v582_v62 = vmul.f32 %v512_v59, %v512_v59  ;;  %v527_v63 = vadd.f32 %v1253_v61, %v1559_v52 }
 0x107   : > { %v521_v0 = vpop.f32.mrf.mxu0 }
 0x108   : > { %v522_v1 = vadd.f32 %v1559_v52, %v521_v0  ;;  %1328 = vmatprep.mubr.f32.mxu1 %v582_v62  ;;  %v585_v2 = vmul.f32 %v527_v63, %v527_v63 }
 0x109   : > { %v1256_v3 = vpop.f32.mrf.mxu0  ;;  %1329 = vmatmul.mubr.f32.gmra.mxu1 %v583_v60 }
 0x10a   : > { %v584_v4 = vmul.f32 %v522_v1, %v522_v1  ;;  %v537_v5 = vadd.f32 %v1256_v3, %v1559_v52 }
 0x10b   : > { %v531_v6 = vpop.f32.mrf.mxu0 }
 0x10c   : > { %v532_v7 = vadd.f32 %v1559_v52, %v531_v6  ;;  %1331 = vmatprep.mubr.f32.mxu1 %v584_v4  ;;  %v587_v8 = vmul.f32 %v537_v5, %v537_v5 }
 0x10d   : > { %v1259_v9 = vpop.f32.mrf.mxu0  ;;  %1332 = vmatmul.mubr.f32.gmra.mxu1 %v585_v2 }
 0x10e   : > { %v586_v10 = vmul.f32 %v532_v7, %v532_v7  ;;  %v547_v11 = vadd.f32 %v1259_v9, %v1559_v52 }
 0x10f   : > { %v541_v12 = vpop.f32.mrf.mxu0 }
 0x110   : > { %v542_v13 = vadd.f32 %v1559_v52, %v541_v12  ;;  %1334 = vmatprep.mubr.f32.mxu1 %v586_v10  ;;  %v589_v14 = vmul.f32 %v547_v11, %v547_v11 }
 0x111   : > { %v1262_v15 = vpop.f32.mrf.mxu0  ;;  %1335 = vmatmul.mubr.f32.gmra.mxu1 %v587_v8 }
 0x112   : > { %v588_v16 = vmul.f32 %v542_v13, %v542_v13  ;;  %v557_v17 = vadd.f32 %v1262_v15, %v1559_v52 }
 0x113   : > { %v551_v18 = vpop.f32.mrf.mxu0 }
 0x114   : > { %v552_v19 = vadd.f32 %v1559_v52, %v551_v18  ;;  %1337 = vmatprep.mubr.f32.mxu1 %v588_v16  ;;  %v591_v20 = vmul.f32 %v557_v17, %v557_v17 }
 0x115   : > { %1338 = vmatmul.mubr.f32.gmra.mxu1 %v589_v14 }
 0x116   : > { %v590_v21 = vmul.f32 %v552_v19, %v552_v19 }
 0x118   : > { %1340 = vmatprep.mubr.f32.mxu1 %v590_v21 }
 0x119   : > { %1341 = vmatmul.mubr.f32.gmra.mxu1 %v591_v20 }
 0x19d   : > { %v1297_v23 = vpop.f32.mrf.mxu0 }
 0x19e   : > { %v668_v24 = vadd.f32 %v1297_v23, %v1596_v22 }
 0x19f   : > { %v662_v25 = vpop.f32.mrf.mxu0 }
 0x1a0   : > { %v822_v52 = vmul.f32 %v668_v24, %v668_v24  ;;  %v663_v27 = vadd.f32 %v1596_v22, %v662_v25 }
 0x1a1   : > { %v1300_v28 = vpop.f32.mrf.mxu0 }
 0x1a2   : > { %v821_v29 = vmul.f32 %v663_v27, %v663_v27  ;;  %v678_v30 = vadd.f32 %v1300_v28, %v1596_v22  ;;  %v858_v31 = vmul.f32 %v1602_v26, %v822_v52 }
 0x1a3   : > { %v672_v32 = vpop.f32.mrf.mxu0 }
 0x1a4   : > { %v824_v33 = vmul.f32 %v678_v30, %v678_v30  ;;  %v673_v34 = vadd.f32 %v1596_v22, %v672_v32  ;;  %891 = vadd.xlane.f32.xlu0 %v858_v31  ;;  %v857_v39 = vmul.f32 %v1602_v26, %v821_v29 }
 0x1a5   : > { %v1303_v35 = vpop.f32.mrf.mxu0 }
 0x1a6   : > { %v823_v36 = vmul.f32 %v673_v34, %v673_v34  ;;  %v688_v37 = vadd.f32 %v1303_v35, %v1596_v22  ;;  %v860_v38 = vmul.f32 %v1602_v26, %v824_v33 }
 0x1a7   : > { %v682_v40 = vpop.f32.mrf.mxu0 }
 0x1a8   : > { %v683_v41 = vadd.f32 %v1596_v22, %v682_v40  ;;  %895 = vadd.xlane.f32.xlu1 %v860_v38  ;;  %889 = vadd.xlane.f32.xlu0 %v857_v39  ;;  %v826_v43 = vmul.f32 %v688_v37, %v688_v37  ;;  %v859_v46 = vmul.f32 %v1602_v26, %v823_v36 }
 0x1a9   : > { %v1306_v42 = vpop.f32.mrf.mxu1 }
 0x1aa   : > { %v825_v44 = vmul.f32 %v683_v41, %v683_v41  ;;  %v698_v45 = vadd.f32 %v1306_v42, %v1596_v22  ;;  %v862_v55 = vmul.f32 %v1602_v26, %v826_v43 }
 0x1ab   : > { %v692_v47 = vpop.f32.mrf.mxu1 }
 0x1ac   : > { %v693_v48 = vadd.f32 %v1596_v22, %v692_v47  ;;  %893 = vadd.xlane.f32.xlu1 %v859_v46  ;;  %v861_v49 = vmul.f32 %v1602_v26, %v825_v44  ;;  %v828_v51 = vmul.f32 %v698_v45, %v698_v45 }
 0x1ad   : > { %v1309_v50 = vpop.f32.mrf.mxu1 }
 0x1ae   : > { %v827_v53 = vmul.f32 %v693_v48, %v693_v48  ;;  %v708_v54 = vadd.f32 %v1309_v50, %v1596_v22  ;;  %897 = vadd.xlane.f32.xlu0 %v861_v49  ;;  %v864_v63 = vmul.f32 %v1602_v26, %v828_v51 }
 0x1af   : > { %v702_v56 = vpop.f32.mrf.mxu1 }
 0x1b0   : > { %v703_v57 = vadd.f32 %v1596_v22, %v702_v56  ;;  %899 = vadd.xlane.f32.xlu1 %v862_v55  ;;  %v863_v58 = vmul.f32 %v1602_v26, %v827_v53  ;;  %v830_v60 = vmul.f32 %v708_v54, %v708_v54 }
 0x1b1   : > { %v1312_v59 = vpop.f32.mrf.mxu1 }
 0x1b2   : > { %v829_v61 = vmul.f32 %v703_v57, %v703_v57  ;;  %v718_v62 = vadd.f32 %v1312_v59, %v1596_v22  ;;  %901 = vadd.xlane.f32.xlu0 %v863_v58  ;;  %v866_v7 = vmul.f32 %v1602_v26, %v830_v60 }
 0x1b3   : > { %v712_v0 = vpop.f32.mrf.mxu1 }
 0x1b4   : > { %v713_v1 = vadd.f32 %v1596_v22, %v712_v0  ;;  %903 = vadd.xlane.f32.xlu1 %v864_v63  ;;  %v865_v2 = vmul.f32 %v1602_v26, %v829_v61  ;;  %v832_v4 = vmul.f32 %v718_v62, %v718_v62 }
 0x1b5   : > { %v1315_v3 = vpop.f32.mrf.mxu1 }
 0x1b6   : > { %v831_v5 = vmul.f32 %v713_v1, %v713_v1  ;;  %v728_v6 = vadd.f32 %v1315_v3, %v1596_v22  ;;  %905 = vadd.xlane.f32.xlu0 %v865_v2  ;;  %v868_v15 = vmul.f32 %v1602_v26, %v832_v4 }
 0x1b7   : > { %v722_v8 = vpop.f32.mrf.mxu1 }
 0x1b8   : > { %v723_v9 = vadd.f32 %v1596_v22, %v722_v8  ;;  %907 = vadd.xlane.f32.xlu1 %v866_v7  ;;  %v867_v10 = vmul.f32 %v1602_v26, %v831_v5  ;;  %v834_v12 = vmul.f32 %v728_v6, %v728_v6 }
 0x1b9   : > { %v1318_v11 = vpop.f32.mrf.mxu1 }
 0x1ba   : > { %v833_v13 = vmul.f32 %v723_v9, %v723_v9  ;;  %v738_v14 = vadd.f32 %v1318_v11, %v1596_v22  ;;  %909 = vadd.xlane.f32.xlu0 %v867_v10  ;;  %v870_v24 = vmul.f32 %v1602_v26, %v834_v12 }
 0x1bb   : > { %v732_v16 = vpop.f32.mrf.mxu1 }
 0x1bc   : > { %v733_v17 = vadd.f32 %v1596_v22, %v732_v16  ;;  %911 = vadd.xlane.f32.xlu1 %v868_v15  ;;  %v869_v18 = vmul.f32 %v1602_v26, %v833_v13  ;;  %v836_v20 = vmul.f32 %v738_v14, %v738_v14 }
 0x1bd   : > { %v1321_v19 = vpop.f32.mrf.mxu1 }
 0x1be   : > { %v835_v21 = vmul.f32 %v733_v17, %v733_v17  ;;  %v748_v23 = vadd.f32 %v1321_v19, %v1596_v22  ;;  %913 = vadd.xlane.f32.xlu0 %v869_v18  ;;  %v872_v32 = vmul.f32 %v1602_v26, %v836_v20 }
 0x1bf   : > { %v742_v25 = vpop.f32.mrf.mxu1 }
 0x1c0   : > { %v743_v52 = vadd.f32 %v1596_v22, %v742_v25  ;;  %915 = vadd.xlane.f32.xlu1 %v870_v24  ;;  %v871_v27 = vmul.f32 %v1602_v26, %v835_v21  ;;  %v838_v29 = vmul.f32 %v748_v23, %v748_v23 }
 0x1c1   : > { %v1324_v28 = vpop.f32.mrf.mxu1 }
 0x1c2   : > { %v837_v30 = vmul.f32 %v743_v52, %v743_v52  ;;  %v758_v31 = vadd.f32 %v1324_v28, %v1596_v22  ;;  %917 = vadd.xlane.f32.xlu0 %v871_v27  ;;  %v874_v40 = vmul.f32 %v1602_v26, %v838_v29  ;;  %v1667_v27 = vstv %s953_s15 }
 0x1c3   : > { %v752_v33 = vpop.f32.mrf.mxu1 }
 0x1c4   : > { %v753_v34 = vadd.f32 %v1596_v22, %v752_v33  ;;  %919 = vadd.xlane.f32.xlu1 %v872_v32  ;;  %v873_v35 = vmul.f32 %v1602_v26, %v837_v30  ;;  %v840_v37 = vmul.f32 %v758_v31, %v758_v31 }
 0x1c5   : > { %v1327_v36 = vpop.f32.mrf.mxu1 }
 0x1c6   : > { %v839_v38 = vmul.f32 %v753_v34, %v753_v34  ;;  %v768_v39 = vadd.f32 %v1327_v36, %v1596_v22  ;;  %921 = vadd.xlane.f32.xlu0 %v873_v35  ;;  %v876_v48 = vmul.f32 %v1602_v26, %v840_v37 }
 0x1c7   : > { %v762_v41 = vpop.f32.mrf.mxu1 }
 0x1c8   : > { %v763_v42 = vadd.f32 %v1596_v22, %v762_v41  ;;  %923 = vadd.xlane.f32.xlu1 %v874_v40  ;;  %v875_v43 = vmul.f32 %v1602_v26, %v839_v38  ;;  %v842_v45 = vmul.f32 %v768_v39, %v768_v39 }
 0x1c9   : > { %v1330_v44 = vpop.f32.mrf.mxu1 }
 0x1ca   : > { %v841_v46 = vmul.f32 %v763_v42, %v763_v42  ;;  %v778_v47 = vadd.f32 %v1330_v44, %v1596_v22  ;;  %925 = vadd.xlane.f32.xlu0 %v875_v43  ;;  %v878_v57 = vmul.f32 %v1602_v26, %v842_v45 }
 0x1cb   : > { %v772_v49 = vpop.f32.mrf.mxu1 }
 0x1cc   : > { %v773_v50 = vadd.f32 %v1596_v22, %v772_v49  ;;  %927 = vadd.xlane.f32.xlu1 %v876_v48  ;;  %v877_v51 = vmul.f32 %v1602_v26, %v841_v46  ;;  %v844_v54 = vmul.f32 %v778_v47, %v778_v47 }
 0x1cd   : > { %v1333_v53 = vpop.f32.mrf.mxu1 }
 0x1ce   : > { %v843_v55 = vmul.f32 %v773_v50, %v773_v50  ;;  %v788_v56 = vadd.f32 %v1333_v53, %v1596_v22  ;;  %929 = vadd.xlane.f32.xlu0 %v877_v51  ;;  %v880_v1 = vmul.f32 %v1602_v26, %v844_v54 }
 0x1cf   : > { %v782_v58 = vpop.f32.mrf.mxu1 }
 0x1d0   : > { %v783_v59 = vadd.f32 %v1596_v22, %v782_v58  ;;  %931 = vadd.xlane.f32.xlu1 %v878_v57  ;;  %v879_v60 = vmul.f32 %v1602_v26, %v843_v55  ;;  %v846_v62 = vmul.f32 %v788_v56, %v788_v56 }
 0x1d1   : > { %v1336_v61 = vpop.f32.mrf.mxu1 }
 0x1d2   : > { %v845_v63 = vmul.f32 %v783_v59, %v783_v59  ;;  %v798_v0 = vadd.f32 %v1336_v61, %v1596_v22  ;;  %933 = vadd.xlane.f32.xlu0 %v879_v60  ;;  %v882_v9 = vmul.f32 %v1602_v26, %v846_v62 }
 0x1d3   : > { %v792_v2 = vpop.f32.mrf.mxu1 }
 0x1d4   : > { %v793_v3 = vadd.f32 %v1596_v22, %v792_v2  ;;  %935 = vadd.xlane.f32.xlu1 %v880_v1  ;;  %v881_v4 = vmul.f32 %v1602_v26, %v845_v63  ;;  %v848_v6 = vmul.f32 %v798_v0, %v798_v0 }
 0x1d5   : > { %v1339_v5 = vpop.f32.mrf.mxu1 }
 0x1d6   : > { %v847_v7 = vmul.f32 %v793_v3, %v793_v3  ;;  %v808_v8 = vadd.f32 %v1339_v5, %v1596_v22  ;;  %937 = vadd.xlane.f32.xlu0 %v881_v4  ;;  %v884_v17 = vmul.f32 %v1602_v26, %v848_v6 }
 0x1d7   : > { %v802_v10 = vpop.f32.mrf.mxu1 }
 0x1d8   : > { %v803_v11 = vadd.f32 %v1596_v22, %v802_v10  ;;  %939 = vadd.xlane.f32.xlu1 %v882_v9  ;;  %v883_v12 = vmul.f32 %v1602_v26, %v847_v7  ;;  %v850_v14 = vmul.f32 %v808_v8, %v808_v8 }
 0x1d9   : > { %v1342_v13 = vpop.f32.mrf.mxu1 }
 0x1da   : > { %v849_v15 = vmul.f32 %v803_v11, %v803_v11  ;;  %v818_v16 = vadd.f32 %v1342_v13, %v1596_v22  ;;  %941 = vadd.xlane.f32.xlu0 %v883_v12  ;;  %v886_v24 = vmul.f32 %v1602_v26, %v850_v14 }
 0x1db   : > { %v812_v18 = vpop.f32.mrf.mxu1 }
 0x1dc   : > { %v852_v19 = vmul.f32 %v818_v16, %v818_v16  ;;  %v813_v20 = vadd.f32 %v1596_v22, %v812_v18  ;;  %943 = vadd.xlane.f32.xlu1 %v884_v17  ;;  %v885_v21 = vmul.f32 %v1602_v26, %v849_v15 }
 0x1de   : > { %v851_v23 = vmul.f32 %v813_v20, %v813_v20  ;;  %945 = vadd.xlane.f32.xlu0 %v885_v21  ;;  %v888_v25 = vmul.f32 %v1602_v26, %v852_v19 }
 0x1e0   : > { %947 = vadd.xlane.f32.xlu1 %v886_v24  ;;  %v887_v52 = vmul.f32 %v1602_v26, %v851_v23 }
 0x1e2   : > { %949 = vadd.xlane.f32.xlu0 %v887_v52 }
 0x1e4   : > { %951 = vadd.xlane.f32.xlu1 %v888_v25 }
 0x22d   : > { %v892_v22 = vpop.xlane.xlu0 %891 }
 0x22e   : > { %v956_v26 = vadd.f32 %v1667_v27, %v892_v22 }
 0x230   : > { %989 = vst.msk [vmem:[%s1674_s2 + $0x8] sm:$0xff] %vm987_vm2, %v956_v26 }
 0x231   : > { %v896_v28 = vpop.xlane.xlu1 %895  ;;  %v890_v29 = vpop.xlane.xlu0 %889 }
 0x232   : > { %v958_v30 = vadd.f32 %v1667_v27, %v896_v28  ;;  %v955_v31 = vadd.f32 %v1667_v27, %v890_v29 }
 0x234   : > { %991 = vst.msk [vmem:[%s1674_s2 + $0x18] sm:$0xff] %vm987_vm2, %v958_v30  ;;  %988 = vst.msk [vmem:[%s1674_s2] sm:$0xff] %vm987_vm2, %v955_v31 }
 0x235   : > { %v894_v32 = vpop.xlane.xlu1 %893 }
 0x236   : > { %v957_v33 = vadd.f32 %v1667_v27, %v894_v32 }
 0x237   : > { %v898_v34 = vpop.xlane.xlu0 %897 }
 0x238   : > { %990 = vst.msk [vmem:[%s1674_s2 + $0x10] sm:$0xff] %vm987_vm2, %v957_v33  ;;  %v959_v35 = vadd.f32 %v1667_v27, %v898_v34 }
 0x239   : > { %v900_v36 = vpop.xlane.xlu1 %899 }
 0x23a   : > { %992 = vst.msk [vmem:[%s1674_s2 + $0x20] sm:$0xff] %vm987_vm2, %v959_v35  ;;  %v960_v37 = vadd.f32 %v1667_v27, %v900_v36 }
 0x23b   : > { %v902_v38 = vpop.xlane.xlu0 %901 }
 0x23c   : > { %993 = vst.msk [vmem:[%s1674_s2 + $0x28] sm:$0xff] %vm987_vm2, %v960_v37  ;;  %v961_v39 = vadd.f32 %v1667_v27, %v902_v38 }
 0x23d   : > { %v904_v40 = vpop.xlane.xlu1 %903 }
 0x23e   : > { %994 = vst.msk [vmem:[%s1674_s2 + $0x30] sm:$0xff] %vm987_vm2, %v961_v39  ;;  %v962_v41 = vadd.f32 %v1667_v27, %v904_v40 }
 0x23f   : > { %v906_v42 = vpop.xlane.xlu0 %905 }
 0x240   : > { %995 = vst.msk [vmem:[%s1674_s2 + $0x38] sm:$0xff] %vm987_vm2, %v962_v41  ;;  %v963_v43 = vadd.f32 %v1667_v27, %v906_v42 }
 0x241   : > { %v908_v44 = vpop.xlane.xlu1 %907 }
 0x242   : > { %996 = vst.msk [vmem:[%s1674_s2 + $0x40] sm:$0xff] %vm987_vm2, %v963_v43  ;;  %v964_v45 = vadd.f32 %v1667_v27, %v908_v44 }
 0x243   : > { %v910_v46 = vpop.xlane.xlu0 %909 }
 0x244   : > { %997 = vst.msk [vmem:[%s1674_s2 + $0x48] sm:$0xff] %vm987_vm2, %v964_v45  ;;  %v965_v47 = vadd.f32 %v1667_v27, %v910_v46 }
 0x245   : > { %v912_v48 = vpop.xlane.xlu1 %911 }
 0x246   : > { %998 = vst.msk [vmem:[%s1674_s2 + $0x50] sm:$0xff] %vm987_vm2, %v965_v47  ;;  %v966_v49 = vadd.f32 %v1667_v27, %v912_v48 }
 0x247   : > { %v914_v50 = vpop.xlane.xlu0 %913 }
 0x248   : > { %999 = vst.msk [vmem:[%s1674_s2 + $0x58] sm:$0xff] %vm987_vm2, %v966_v49  ;;  %v967_v51 = vadd.f32 %v1667_v27, %v914_v50 }
 0x249   : > { %v916_v53 = vpop.xlane.xlu1 %915 }
 0x24a   : > { %1000 = vst.msk [vmem:[%s1674_s2 + $0x60] sm:$0xff] %vm987_vm2, %v967_v51  ;;  %v968_v54 = vadd.f32 %v1667_v27, %v916_v53 }
 0x24b   : > { %v918_v55 = vpop.xlane.xlu0 %917 }
 0x24c   : > { %1001 = vst.msk [vmem:[%s1674_s2 + $0x68] sm:$0xff] %vm987_vm2, %v968_v54  ;;  %v969_v56 = vadd.f32 %v1667_v27, %v918_v55 }
 0x24d   : > { %v920_v57 = vpop.xlane.xlu1 %919 }
 0x24e   : > { %1002 = vst.msk [vmem:[%s1674_s2 + $0x70] sm:$0xff] %vm987_vm2, %v969_v56  ;;  %v970_v58 = vadd.f32 %v1667_v27, %v920_v57 }
 0x24f   : > { %v922_v59 = vpop.xlane.xlu0 %921 }
 0x250   : > { %1003 = vst.msk [vmem:[%s1674_s2 + $0x78] sm:$0xff] %vm987_vm2, %v970_v58  ;;  %v971_v60 = vadd.f32 %v1667_v27, %v922_v59 }
 0x251   : > { %v924_v61 = vpop.xlane.xlu1 %923 }
 0x252   : > { %1004 = vst.msk [vmem:[%s1674_s2 + $0x80] sm:$0xff] %vm987_vm2, %v971_v60  ;;  %v972_v62 = vadd.f32 %v1667_v27, %v924_v61 }
 0x253   : > { %v926_v63 = vpop.xlane.xlu0 %925 }
 0x254   : > { %1005 = vst.msk [vmem:[%s1674_s2 + $0x88] sm:$0xff] %vm987_vm2, %v972_v62  ;;  %v973_v0 = vadd.f32 %v1667_v27, %v926_v63 }
 0x255   : > { %v928_v1 = vpop.xlane.xlu1 %927 }
 0x256   : > { %1006 = vst.msk [vmem:[%s1674_s2 + $0x90] sm:$0xff] %vm987_vm2, %v973_v0  ;;  %v974_v2 = vadd.f32 %v1667_v27, %v928_v1 }
 0x257   : > { %v930_v3 = vpop.xlane.xlu0 %929 }
 0x258   : > { %1007 = vst.msk [vmem:[%s1674_s2 + $0x98] sm:$0xff] %vm987_vm2, %v974_v2  ;;  %v975_v4 = vadd.f32 %v1667_v27, %v930_v3 }
 0x259   : > { %v932_v5 = vpop.xlane.xlu1 %931 }
 0x25a   : > { %1008 = vst.msk [vmem:[%s1674_s2 + $0xa0] sm:$0xff] %vm987_vm2, %v975_v4  ;;  %v976_v6 = vadd.f32 %v1667_v27, %v932_v5 }
 0x25b   : > { %v934_v7 = vpop.xlane.xlu0 %933 }
 0x25c   : > { %1009 = vst.msk [vmem:[%s1674_s2 + $0xa8] sm:$0xff] %vm987_vm2, %v976_v6  ;;  %v977_v8 = vadd.f32 %v1667_v27, %v934_v7 }
 0x25d   : > { %v936_v9 = vpop.xlane.xlu1 %935 }
 0x25e   : > { %1010 = vst.msk [vmem:[%s1674_s2 + $0xb0] sm:$0xff] %vm987_vm2, %v977_v8  ;;  %v978_v10 = vadd.f32 %v1667_v27, %v936_v9 }
 0x25f   : > { %v938_v11 = vpop.xlane.xlu0 %937 }
 0x260   : > { %1011 = vst.msk [vmem:[%s1674_s2 + $0xb8] sm:$0xff] %vm987_vm2, %v978_v10  ;;  %v979_v12 = vadd.f32 %v1667_v27, %v938_v11 }
 0x261   : > { %v940_v13 = vpop.xlane.xlu1 %939 }
 0x262   : > { %1012 = vst.msk [vmem:[%s1674_s2 + $0xc0] sm:$0xff] %vm987_vm2, %v979_v12  ;;  %v980_v14 = vadd.f32 %v1667_v27, %v940_v13 }
 0x263   : > { %v942_v15 = vpop.xlane.xlu0 %941 }
 0x264   : > { %1013 = vst.msk [vmem:[%s1674_s2 + $0xc8] sm:$0xff] %vm987_vm2, %v980_v14  ;;  %v981_v16 = vadd.f32 %v1667_v27, %v942_v15 }
 0x265   : > { %v944_v17 = vpop.xlane.xlu1 %943 }
 0x266   : > { %1014 = vst.msk [vmem:[%s1674_s2 + $0xd0] sm:$0xff] %vm987_vm2, %v981_v16  ;;  %v982_v18 = vadd.f32 %v1667_v27, %v944_v17 }
 0x267   : > { %v946_v19 = vpop.xlane.xlu0 %945 }
 0x268   : > { %1015 = vst.msk [vmem:[%s1674_s2 + $0xd8] sm:$0xff] %vm987_vm2, %v982_v18  ;;  %v983_v20 = vadd.f32 %v1667_v27, %v946_v19 }
 0x269   : > { %v948_v21 = vpop.xlane.xlu1 %947 }
 0x26a   : > { %1016 = vst.msk [vmem:[%s1674_s2 + $0xe0] sm:$0xff] %vm987_vm2, %v983_v20  ;;  %v984_v23 = vadd.f32 %v1667_v27, %v948_v21 }
 0x26b   : > { %v950_v24 = vpop.xlane.xlu0 %949 }
 0x26c   : > { %1017 = vst.msk [vmem:[%s1674_s2 + $0xe8] sm:$0xff] %vm987_vm2, %v984_v23  ;;  %v985_v25 = vadd.f32 %v1667_v27, %v950_v24 }
 0x26d   : > { %v952_v52 = vpop.xlane.xlu1 %951 }
 0x26e   : > { %1018 = vst.msk [vmem:[%s1674_s2 + $0xf0] sm:$0xff] %vm987_vm2, %v985_v25  ;;  %v986_v22 = vadd.f32 %v1667_v27, %v952_v52 }
 0x270   : > { %1019 = vst.msk [vmem:[%s1674_s2 + $0xf8] sm:$0xff] %vm987_vm2, %v986_v22 }
 0x271 PF: > { %s14_s14 = sadd.s32 1, %s1389_s14  }
 0x272   : > { %p11_p4 = scmp.ge.s32.totalorder %s14_s14, 4  }
 0x274   :  { %13 = sbr.rel (!%p11_p4) target bundleno = 2 (0x2), region = 62 }

</bundles_post_ra>
